<compile_context>
chip_gen: v6e
topology: v6e:2x2x1
jax: 0.10.0
libtpu: 0.0.40
codegen_flags: <defaults>
</compile_context>

<pallas_src>
import jax
import jax.numpy as jnp
from jax.experimental import pallas as pl
from jax.experimental.pallas import tpu as pltpu


def _round_up(x, m):
    return (x + m - 1) // m * m


def dense_act_dense_kernel(x_ref, wi_ref, wo_ref, o_ref):
    # x_ref: (TM, d_in) bf16; wi_ref: (d_in, d_ff) bf16; wo_ref: (d_ff, d_model)
    # bf16; o_ref: (TM, d_model) f32.
    h = jnp.dot(x_ref[...], wi_ref[...], preferred_element_type=jnp.float32)
    h = jnp.maximum(h, 0.0)                 # dense_act_fn = "relu"
    # dropout: identity in eval mode.
    h = h.astype(wo_ref.dtype)              # matches torch cast to wo.weight.dtype
    o_ref[...] = jnp.dot(h, wo_ref[...],
                         preferred_element_type=jnp.float32).astype(o_ref.dtype)


def dense_act_dense_pallas(x, wi, wo, *, tm=512, compute_dtype=jnp.bfloat16):
    """x: (N, d_in), wi: (d_in, d_ff), wo: (d_ff, d_model) -> (N, d_model) f32."""
    N, d_in = x.shape
    d_ff = wi.shape[1]
    d_model = wo.shape[1]

    # Tile the token dim; clamp for tiny N and pad N up to a multiple of the tile.
    tm = max(8, min(tm, _round_up(N, 8)))
    n_pad = _round_up(N, tm)
    if n_pad != N:
        x = jnp.pad(x, ((0, n_pad - N), (0, 0)))

    # bf16 operands, f32 accumulation inside the kernel (MXU-friendly).
    x = x.astype(compute_dtype)
    wi = wi.astype(compute_dtype)
    wo = wo.astype(compute_dtype)

    grid = (n_pad // tm,)

    # VMEM budget: double-buffered x tiles + resident weights + f32 out tiles +
    # the f32 intermediate. Leave 2x headroom, clamp to a sane range.
    itemsize = jnp.dtype(compute_dtype).itemsize
    vmem_bytes = (2 * itemsize * tm * d_in                       # x tiles (x2)
                  + 2 * itemsize * (d_in * d_ff + d_ff * d_model)  # weights (x2 bufs)
                  + 2 * 4 * tm * d_model                         # out tiles (x2)
                  + 4 * tm * d_ff)                               # relu intermediate
    vmem_limit = int(min(max(2 * vmem_bytes, 8 << 20), 32 << 20))

    out = pl.pallas_call(
        dense_act_dense_kernel,
        out_shape=jax.ShapeDtypeStruct((n_pad, d_model), jnp.float32),
        grid_spec=pltpu.PrefetchScalarGridSpec(
            num_scalar_prefetch=0,
            grid=grid,
            in_specs=[
                pl.BlockSpec((tm, d_in), lambda i: (i, 0)),       # token tile
                pl.BlockSpec((d_in, d_ff), lambda i: (0, 0)),     # wi (resident)
                pl.BlockSpec((d_ff, d_model), lambda i: (0, 0)),  # wo (resident)
            ],
            out_specs=pl.BlockSpec((tm, d_model), lambda i: (i, 0)),
        ),
        compiler_params=pltpu.CompilerParams(
            dimension_semantics=("parallel",),
            vmem_limit_bytes=vmem_limit,
        ),
    )(x, wi, wo)

    if n_pad != N:
        out = out[:N]
    return out


def pba_dense_act_dense_forward(hidden_states, wi, wo, *, tm=512):
    """hidden_states: (..., d_in) -> (..., d_model)."""
    lead = hidden_states.shape[:-1]
    d_in = hidden_states.shape[-1]
    x = hidden_states.reshape(-1, d_in)
    out = dense_act_dense_pallas(x, wi, wo, tm=tm)
    return out.reshape(*lead, wo.shape[1])


def reference_forward(x_in, wi, wo):
    h = jnp.maximum(jnp.einsum("bsd,df->bsf", x_in, wi), 0.0)
    return jnp.einsum("bsf,fm->bsm", h, wo)


if __name__ == "__main__":
    # Config (SwitchTransformers-style): dense_act_fn = relu, dropout eval-mode.
    B, S = 2, 8
    d_model = 128
    d_ff = 256
    behavior_dim = 64
    num_behavior = 4
    d_in = d_model + behavior_dim          # behavior_injection=True

    key = jax.random.PRNGKey(0)
    k_x, k_wi, k_wo, k_be, k_beh = jax.random.split(key, 5)

    wi = 0.02 * jax.random.normal(k_wi, (d_in, d_ff), jnp.float32)
    wo = 0.02 * jax.random.normal(k_wo, (d_ff, d_model), jnp.float32)
    behavior_embedding = 0.02 * jax.random.normal(
        k_be, (num_behavior + 1, behavior_dim), jnp.float32)

    hidden_states = jax.random.normal(k_x, (B, S, d_model), jnp.float32)
    behavior_index = jax.random.randint(k_beh, (B, S), 0, num_behavior + 1, jnp.int32)

    # behavior_injection=True: the parent module concatenates the behavior
    # embedding onto hidden_states before calling DenseActDense.
    behavior_emb = jnp.take(behavior_embedding, behavior_index, axis=0)
    x_in = jnp.concatenate([hidden_states, behavior_emb], axis=-1)   # (B, S, d_in)

    out = pba_dense_act_dense_forward(x_in, wi, wo)
    out = jax.block_until_ready(out)

    ref = reference_forward(x_in, wi, wo)
    assert out.shape == (B, S, d_model)
    # bf16 operands / f32 accumulation -> looser tolerance than pure f32.
    assert jnp.allclose(out, ref, atol=2e-2, rtol=2e-2), "mismatch vs reference"

    print("KERNEL_OK")
</pallas_src>

<mosaic_0001>
module attributes {stable_mosaic.version = 11 : i64} {
  func.func @dense_act_dense_kernel(%arg0: i32, %arg1: memref<16x192xbf16, #tpu.memory_space<vmem>>, %arg2: memref<192x256xbf16, #tpu.memory_space<vmem>>, %arg3: memref<256x128xbf16, #tpu.memory_space<vmem>>, %arg4: memref<16x128xf32, #tpu.memory_space<vmem>>) attributes {dimension_semantics = [#tpu.dimension_semantics<parallel>], iteration_bounds = array<i64: 1>, scalar_prefetch = 0 : i64, scratch_operands = 0 : i64, tpu.core_type = #tpu.core_type<tc>, window_params = [{transform_indices = @transform_0, window_bounds = array<i64: 16, 192>}, {pipeline_mode = #tpu.pipeline_mode<synchronous>, transform_indices = @transform_1, window_bounds = array<i64: 192, 256>}, {pipeline_mode = #tpu.pipeline_mode<synchronous>, transform_indices = @transform_2, window_bounds = array<i64: 256, 128>}, {transform_indices = @transform_3, window_bounds = array<i64: 16, 128>}]} {
    %c0 = arith.constant 0 : index
    %c0_0 = arith.constant 0 : index
    %0 = vector.load %arg1[%c0, %c0_0] : memref<16x192xbf16, #tpu.memory_space<vmem>>, vector<16x192xbf16>
    %c0_1 = arith.constant 0 : index
    %c0_2 = arith.constant 0 : index
    %1 = vector.load %arg2[%c0_1, %c0_2] : memref<192x256xbf16, #tpu.memory_space<vmem>>, vector<192x256xbf16>
    %cst = arith.constant dense<0.000000e+00> : vector<16x256xf32>
    %2 = tpu.matmul %0, %1, %cst {dimension_numbers = #tpu.dot_dimension_numbers<[1], [0], [0], [1], [0, 0, 1, 1], [], []>} : vector<16x192xbf16>, vector<192x256xbf16>, vector<16x256xf32> -> vector<16x256xf32>
    %cst_3 = arith.constant 0.000000e+00 : f32
    %3 = vector.broadcast %cst_3 : f32 to vector<16x256xf32>
    %4 = arith.maximumf %2, %3 : vector<16x256xf32>
    %5 = arith.truncf %4 : vector<16x256xf32> to vector<16x256xbf16>
    %c0_4 = arith.constant 0 : index
    %c0_5 = arith.constant 0 : index
    %6 = vector.load %arg3[%c0_4, %c0_5] : memref<256x128xbf16, #tpu.memory_space<vmem>>, vector<256x128xbf16>
    %cst_6 = arith.constant dense<0.000000e+00> : vector<16x128xf32>
    %7 = tpu.matmul %5, %6, %cst_6 {dimension_numbers = #tpu.dot_dimension_numbers<[1], [0], [0], [1], [0, 0, 1, 1], [], []>} : vector<16x256xbf16>, vector<256x128xbf16>, vector<16x128xf32> -> vector<16x128xf32>
    %c0_7 = arith.constant 0 : index
    %c0_8 = arith.constant 0 : index
    %8 = vector.load %arg4[%c0_7, %c0_8] : memref<16x128xf32, #tpu.memory_space<vmem>>, vector<16x128xf32>
    tpu.vector_store %arg4[%c0_7, %c0_8], %7 {strides = array<i32>} : memref<16x128xf32, #tpu.memory_space<vmem>>, vector<16x128xf32>,
    return
  }
  func.func @transform_0(%arg0: i32) -> (i32, i32) {
    %c0_i32 = arith.constant 0 : i32
    %c0_i32_0 = arith.constant 0 : i32
    return %arg0, %c0_i32 : i32, i32
  }
  func.func @transform_1(%arg0: i32) -> (i32, i32) {
    %c0_i32 = arith.constant 0 : i32
    %c0_i32_0 = arith.constant 0 : i32
    %c0_i32_1 = arith.constant 0 : i32
    return %c0_i32, %c0_i32_0 : i32, i32
  }
  func.func @transform_2(%arg0: i32) -> (i32, i32) {
    %c0_i32 = arith.constant 0 : i32
    %c0_i32_0 = arith.constant 0 : i32
    %c0_i32_1 = arith.constant 0 : i32
    return %c0_i32, %c0_i32_0 : i32, i32
  }
  func.func @transform_3(%arg0: i32) -> (i32, i32) {
    %c0_i32 = arith.constant 0 : i32
    %c0_i32_0 = arith.constant 0 : i32
    return %arg0, %c0_i32 : i32, i32
  }
}

</mosaic_0001>

<bundles_post_ra>
// kernel: tpu_custom_call.1
= control target key start
LH: loop header
LB: loop body
LE: loop exit
PB: predicated region body
PF: predicated region fallthrough
CT: control target
= control target key end

     0   :  { %8 = vsyncpa [#allocation3], 0  ;;  %s717_s0 = inlined_call_operand.hbm [shape: bf16[16,192], index: 0, kind: input, shape index: {}]   ;;  %s718_s1 = inlined_call_operand.hbm [shape: bf16[192,256], index: 1, kind: input, shape index: {}]   ;;  %s719_s2 = inlined_call_operand.hbm [shape: bf16[256,128], index: 2, kind: input, shape index: {}]   ;;  %s720_s3 = inlined_call_operand.hbm [shape: f32[16,128], index: 3, kind: output, shape index: {}]  }
   0x1   :  { %9 = vsyncpa [#allocation6], 0 }
   0x2   :  { %10 = vsyncpa [#allocation4], 0  ;;  %s668_s12 = smov [#allocation5]   ;;  %s669_s14 = smov [#allocation2]  }
   0x3   :  { %s28_s13 = sshll.u32 %s668_s12, 4  ;;  %s16_s15 = sshll.u32 %s669_s14, 4  ;;  %s29_s13 = int_to_ptr.vmem [resolvable:$true] %s28_s13  ;;  %s17_s15 = int_to_ptr.vmem [resolvable:$true] %s16_s15 }
   0x4   :  { %s590_s16 = scalar_lea.vmem %s29_s13, 3072  ;;  %p595_p1 = scmp.lt.s32.totalorder %s29_s13, %s29_s13 }
   0x5   :  { %p591_p0 = scmp.ne.s32.totalorder %s29_s13, %s590_s16  ;;  %p596_p2 = scmp.lt.s32.totalorder %s590_s16, %s590_s16 }
   0x7   :  { %p597_p3 = por %p596_p2, %p595_p1 }
   0x9   :  { %p598_p4 = pnand %p597_p3, %p591_p0 }
   0xb   :  { %601 = shalt.err (!%p598_p4)
}
   0xc   :  { %s670_s17 = smov 128   ;;  %s671_s18 = smov 8  }
   0xd   :  { %34 = dma.hbm_to_vmem [thread:$0]  %s718_s1, 3072, %s29_s13, [#allocation6], %s670_s17, %s670_s17, %s671_s18  }
   0xe   :  { %s610_s21 = scalar_lea.vmem %s17_s15, 256  ;;  %p615_p6 = scmp.lt.s32.totalorder %s17_s15, %s17_s15 }
   0xf   :  { %p611_p5 = scmp.ne.s32.totalorder %s17_s15, %s610_s21  ;;  %p616_p7 = scmp.lt.s32.totalorder %s610_s21, %s610_s21 }
  0x11   :  { %p617_p8 = por %p616_p7, %p615_p6 }
  0x13   :  { %p618_p9 = pnand %p617_p8, %p611_p5 }
  0x15   :  { %621 = shalt.err (!%p618_p9)
}
  0x16   :  { %22 = dma.hbm_to_vmem [thread:$0]  %s717_s0, 256, %s17_s15, [#allocation3], %s670_s17, %s670_s17, %s671_s18  }
  0x17   :  { %s672_s24 = smov [#allocation7]  }
  0x18   :  { %s40_s25 = sshll.u32 %s672_s24, 4  ;;  %s41_s25 = int_to_ptr.vmem [resolvable:$true] %s40_s25 }
  0x19   :  { %s630_s26 = scalar_lea.vmem %s41_s25, 2048  ;;  %p635_p11 = scmp.lt.s32.totalorder %s41_s25, %s41_s25 }
  0x1a   :  { %p631_p10 = scmp.ne.s32.totalorder %s41_s25, %s630_s26  ;;  %p636_p12 = scmp.lt.s32.totalorder %s630_s26, %s630_s26 }
  0x1c   :  { %p637_p13 = por %p636_p12, %p635_p11 }
  0x1e   :  { %p638_p0 = pnand %p637_p13, %p631_p10 }
  0x20   :  { %641 = shalt.err (!%p638_p0)
}
  0x21   :  { %s673_s1 = smov 64   ;;  %s674_s27 = smov 4  }
  0x22   :  { %46 = dma.hbm_to_vmem [thread:$0]  %s719_s2, 2048, %s41_s25, [#allocation6], %s673_s1, %s673_s1, %s674_s27  }
  0x23   :  { %662 = dma.done.wait [#allocation3], 256  }
  0x24   :  { %663 = vsyncadd [#allocation3], 4294967040 }
  0x25   :  { %664 = dma.done.wait [#allocation6], 5120  }
  0x26   :  { %665 = vsyncadd [#allocation6], 4294962176  ;;  %v527_v0 = vld [vmem:[#allocation5 + $0x74] ss:$8 sps:$4 sm:$0xff]   ;;  %v529_v1 = vld [vmem:[#allocation5 + $0x70] ss:$8 sps:$4 sm:$0xff]  }
  0x27   :  { %216 = vmatprep.subr.bf16.mxu0 %v527_v0  ;;  %v530_v2 = vld [vmem:[#allocation5 + $0x64] ss:$8 sps:$4 sm:$0xff]   ;;  %v532_v3 = vld [vmem:[#allocation5 + $0x60] ss:$8 sps:$4 sm:$0xff]   ;;  %v533_v4 = vld [vmem:[#allocation5 + $0x54] ss:$8 sps:$4 sm:$0xff]  }
  0x28   :  { %217 = vmatpush1.bf16.msra.mxu0 %v529_v1  ;;  %v535_v5 = vld [vmem:[#allocation5 + $0x50] ss:$8 sps:$4 sm:$0xff]   ;;  %v536_v6 = vld [vmem:[#allocation5 + $0x44] ss:$8 sps:$4 sm:$0xff]   ;;  %v538_v7 = vld [vmem:[#allocation5 + $0x40] ss:$8 sps:$4 sm:$0xff]  }
  0x29   :  { %218 = vmatprep.subr.bf16.mxu0 %v530_v2  ;;  %v539_v8 = vld [vmem:[#allocation5 + $0x34] ss:$8 sps:$4 sm:$0xff]   ;;  %v541_v9 = vld [vmem:[#allocation5 + $0x30] ss:$8 sps:$4 sm:$0xff]   ;;  %v542_v10 = vld [vmem:[#allocation5 + $0x24] ss:$8 sps:$4 sm:$0xff]  }
  0x2a   :  { %vm212_vm0 = vcmask 523264   ;;  %v544_v11 = vld [vmem:[#allocation5 + $0x20] ss:$8 sps:$4 sm:$0xff]   ;;  %v565_v12 = vld [vmem:[#allocation2 + $0x4] ss:$8 sps:$4 sm:$0xff]   ;;  %s675_s0 = smov [#allocation8]  }
  0x2b   :  { %v545_v13 = vld [vmem:[#allocation5 + $0x14] ss:$8 sps:$4 sm:$0xff]   ;;  %480 = vmatprep.mubr.msk.bf16.mxu0 %vm212_vm0, %v565_v12  ;;  %v570_v18 = vld [vmem:[#allocation7 + $0x68] sm:$0xff]   ;;  %v547_v19 = vld [vmem:[#allocation5 + $0x10] ss:$8 sps:$4 sm:$0xff]   ;;  %s441_s2 = sshll.u32 %s675_s0, 4  ;;  %s442_s2 = int_to_ptr.vmem [resolvable:$true] %s441_s2 }
  0x2c   :  { %219 = vmatpush1.bf16.msra.mxu0 %v532_v3  ;;  %v566_v14 = vld [vmem:[#allocation7 + $0x78] sm:$0xff]   ;;  %v568_v16 = vld [vmem:[#allocation7 + $0x70] sm:$0xff]   ;;  %v548_v20 = vld [vmem:[#allocation5 + $0x4] ss:$8 sps:$4 sm:$0xff]   ;;  %s642_s30 = scalar_lea.vmem %s442_s2, 256  ;;  %p647_p2 = scmp.lt.s32.totalorder %s442_s2, %s442_s2 }
  0x2d   :  { %220 = vmatprep.subr.bf16.mxu0 %v533_v4  ;;  %v567_v15 = vld [vmem:[#allocation7 + $0x38] sm:$0xff]   ;;  %497 = vmatprep.subr.bf16.mxu1 %v566_v14  ;;  %v569_v17 = vld [vmem:[#allocation7 + $0x30] sm:$0xff]   ;;  %v550_v21 = vld [vmem:[#allocation5] ss:$8 sps:$4 sm:$0xff]   ;;  %p643_p1 = scmp.ne.s32.totalorder %s442_s2, %s642_s30  ;;  %p648_p3 = scmp.lt.s32.totalorder %s642_s30, %s642_s30 }
  0x2e   :  { %498 = vmatpush3.bf16.msra.mxu1 %v567_v15  ;;  %v571_v22 = vld [vmem:[#allocation7 + $0x28] sm:$0xff]   ;;  %v551_v23 = vld [vmem:[#allocation5 + $0xb4] ss:$8 sps:$4 sm:$0xff]   ;;  %v572_v24 = vld [vmem:[#allocation7 + $0x60] sm:$0xff]  }
  0x2f   :  { %499 = vmatprep.subr.bf16.mxu1 %v568_v16  ;;  %v573_v25 = vld [vmem:[#allocation7 + $0x20] sm:$0xff]   ;;  %v574_v26 = vld [vmem:[#allocation7 + $0x58] sm:$0xff]   ;;  %v576_v36 = vld [vmem:[#allocation7 + $0x50] sm:$0xff]   ;;  %p649_p4 = por %p648_p3, %p647_p2 }
  0x30   :  { %221 = vmatpush1.bf16.msra.mxu0 %v535_v5  ;;  %v553_v27 = vld [vmem:[#allocation5 + $0xb0] ss:$8 sps:$4 sm:$0xff]   ;;  %v554_v28 = vld [vmem:[#allocation5 + $0xa4] ss:$8 sps:$4 sm:$0xff]   ;;  %v556_v30 = vld [vmem:[#allocation5 + $0xa0] ss:$8 sps:$4 sm:$0xff]  }
  0x31   :  { %222 = vmatprep.subr.bf16.mxu0 %v536_v6  ;;  %v575_v29 = vld [vmem:[#allocation7 + $0x18] sm:$0xff]   ;;  %v560_v33 = vld [vmem:[#allocation5 + $0x84] ss:$8 sps:$4 sm:$0xff]   ;;  %v562_v34 = vld [vmem:[#allocation5 + $0x80] ss:$8 sps:$4 sm:$0xff]   ;;  %p650_p5 = pnand %p649_p4, %p643_p1 }
  0x32   :  { %500 = vmatpush3.bf16.msra.mxu1 %v569_v17  ;;  %v557_v31 = vld [vmem:[#allocation5 + $0x94] ss:$8 sps:$4 sm:$0xff]   ;;  %v559_v32 = vld [vmem:[#allocation5 + $0x90] ss:$8 sps:$4 sm:$0xff]   ;;  %v578_v38 = vld [vmem:[#allocation7 + $0x48] sm:$0xff]  }
  0x33   :  { %501 = vmatprep.subr.bf16.mxu1 %v570_v18  ;;  %v563_v35 = vld [vmem:[#allocation2] ss:$8 sps:$4 sm:$0xff]   ;;  %v579_v39 = vld [vmem:[#allocation7 + $0x8] sm:$0xff]   ;;  %v580_v40 = vld [vmem:[#allocation7 + $0x40] sm:$0xff]  }
  0x34   :  { %223 = vmatpush1.bf16.msra.mxu0 %v538_v7  ;;  %v577_v37 = vld [vmem:[#allocation7 + $0x10] sm:$0xff]   ;;  %v581_v41 = vld [vmem:[#allocation7] sm:$0xff]  }
  0x35   :  { %224 = vmatprep.subr.bf16.mxu0 %v539_v8 }
  0x36   :  { %502 = vmatpush3.bf16.msra.mxu1 %v571_v22 }
  0x37   :  { %503 = vmatprep.subr.bf16.mxu1 %v572_v24 }
  0x38   :  { %225 = vmatpush1.bf16.msra.mxu0 %v541_v9 }
  0x39   :  { %226 = vmatprep.subr.bf16.mxu0 %v542_v10 }
  0x3a   :  { %504 = vmatpush3.bf16.msra.mxu1 %v573_v25 }
  0x3b   :  { %505 = vmatprep.subr.bf16.mxu1 %v574_v26 }
  0x3c   :  { %227 = vmatpush1.bf16.msra.mxu0 %v544_v11 }
  0x3d   :  { %228 = vmatprep.subr.bf16.mxu0 %v545_v13 }
  0x3e   :  { %506 = vmatpush3.bf16.msra.mxu1 %v575_v29 }
  0x3f   :  { %507 = vmatprep.subr.bf16.mxu1 %v576_v36 }
  0x40   :  { %229 = vmatpush1.bf16.msra.mxu0 %v547_v19 }
  0x41   :  { %230 = vmatprep.subr.bf16.mxu0 %v548_v20 }
  0x42   :  { %508 = vmatpush3.bf16.msra.mxu1 %v577_v37 }
  0x43   :  { %509 = vmatprep.subr.bf16.mxu1 %v578_v38 }
  0x44   :  { %231 = vmatpush1.bf16.msra.mxu0 %v550_v21 }
  0x45   :  { %240 = vmatprep.subr.bf16.mxu0 %v551_v23 }
  0x46   :  { %510 = vmatpush3.bf16.msra.mxu1 %v579_v39 }
  0x47   :  { %511 = vmatprep.subr.bf16.mxu1 %v580_v40 }
  0x48   :  { %241 = vmatpush2.bf16.msra.mxu0 %v553_v27 }
  0x49   :  { %242 = vmatprep.subr.bf16.mxu0 %v554_v28 }
  0x4a   :  { %512 = vmatpush3.bf16.msra.mxu1 %v581_v41 }
  0x4c   :  { %243 = vmatpush2.bf16.msra.mxu0 %v556_v30 }
  0x4d   :  { %244 = vmatprep.subr.bf16.mxu0 %v557_v31 }
  0x50   :  { %245 = vmatpush2.bf16.msra.mxu0 %v559_v32 }
  0x51   :  { %246 = vmatprep.subr.bf16.mxu0 %v560_v33 }
  0x54   :  { %247 = vmatpush2.bf16.msra.mxu0 %v562_v34 }
  0x57   :  { %249 = vmatmul.mubr.bf16.vlgmr.msra.gmra.mxu0 %v563_v35 }
 0x117   :  { %v250_v42 = vpop.f32.mrf.mxu0 }
 0x118   :  { %v259_v49 = vmax.f32 %v250_v42, 0.0 }
 0x119   :  { %v252_v43 = vpop.f32.mrf.mxu0 }
 0x11a   :  { %v260_v47 = vmax.f32 %v252_v43, 0.0 }
 0x11b   :  { %v254_v44 = vpop.f32.mrf.mxu0 }
 0x11c   :  { %v261_v45 = vmax.f32 %v254_v44, 0.0 }
 0x11d   :  { %v256_v46 = vpop.f32.mrf.mxu0 }
 0x11e   :  { %v262_v48 = vmax.f32 %v256_v46, 0.0  ;;  %v263_v51 = vpack.c.bf16 %v261_v45, %v259_v49 }
 0x120   :  { %v264_v50 = vpack.c.bf16 %v262_v48, %v260_v47 }
 0x122   :  { %425 = vmatprep.mubr.bf16.mxu1 %v264_v50 }
 0x123   :  { %426 = vmatmul.mubr.bf16.vlgmr.msra.gmra.mxu1 %v263_v51 }
 0x1e3   :  { %v513_v52 = vpop.f32.mrf.mxu1 }
 0x1e5   :  { %v514_v53 = vpop.f32.mrf.mxu1 }
 0x1e6   :  { %v515_v54 = vadd.f32 %v514_v53, %v513_v52 }
 0x1e7   :  { %v516_v55 = vpop.f32.mrf.mxu1 }
 0x1e8   :  { %434 = vst [vmem:[#allocation8] sm:$0xff] %v515_v54 }
 0x1e9   :  { %v517_v56 = vpop.f32.mrf.mxu1 }
 0x1ea   :  { %v518_v57 = vadd.f32 %v517_v56, %v516_v55 }
 0x1ec   :  { %435 = vst [vmem:[#allocation8 + $0x8] sm:$0xff] %v518_v57 }
 0x1ed   :  { %653 = shalt.err (!%p650_p5)
}
 0x1ee   :  { %447 = dma.vmem_to_hbm [thread:$0]  %s442_s2, 256, %s720_s3, [#allocation4], %s670_s17, %s670_s17, %s671_s18  }
 0x1ef   :  { %666 = dma.done.wait [#allocation4], 256  }
 0x1f0   :  { %667 = vsyncadd [#allocation4], 4294967040 }
 0x1f1   :  { %451 = vsyncpa [#allocation3], 1 }
 0x1f2   :  { %452 = vsyncpa [#allocation6], 1 }
 0x1f3   :  { %453 = vsyncpa [#allocation4], 1 }

</bundles_post_ra>
